<compile_context>
chip_gen: v5e
topology: v5e:2x2
jax: 0.10.0
libtpu: 0.0.40
codegen_flags: <defaults>
</compile_context>

<pallas_src>
import functools

import jax
import jax.numpy as jnp
from jax.experimental import pallas as pl
from jax.experimental.pallas import tpu as pltpu


def _round_up(x, m):
    return ((x + m - 1) // m) * m


# --------------------------------------------------------------------------- #
# Kernel: one batch tile of   relu(x@W1+b1) -> relu(·@W2+b2) -> ·@Wh+bh        #
# --------------------------------------------------------------------------- #
def _qnetwork_kernel(x_ref, w1_ref, b1_ref, w2_ref, b2_ref, wh_ref, bh_ref, out_ref):
    compute_dtype = w1_ref.dtype          # bf16 (fast path) or fp32 (exact path)
    # In-kernel operand cast (fp32 HBM input -> bf16 matmul operand); no-op for fp32.
    x = x_ref[...].astype(compute_dtype)

    # fc1 + ReLU  (fp32 MXU accumulate, fp32 bias add)
    h1 = jnp.dot(x, w1_ref[...], preferred_element_type=jnp.float32) + b1_ref[...]
    h1 = jnp.maximum(h1, 0.0).astype(compute_dtype)

    # fc2 + ReLU
    h2 = jnp.dot(h1, w2_ref[...], preferred_element_type=jnp.float32) + b2_ref[...]
    h2 = jnp.maximum(h2, 0.0).astype(compute_dtype)

    # fused advantage(+value) head -> narrow [TM, A] output (A == action_size)
    q = jnp.dot(h2, wh_ref[...], preferred_element_type=jnp.float32) + bh_ref[...]
    out_ref[...] = q.astype(out_ref.dtype)


# --------------------------------------------------------------------------- #
# One-time parameter preparation (K-dim padding + head fusion + dtype cast)    #
# --------------------------------------------------------------------------- #
def prepare_qnetwork_params(params, *, dueling_dqn=False,
                            compute_dtype=jnp.bfloat16, lane=128):
    """Pad hidden dims to full 128-lane tiles, fuse the dueling heads, and cast
    matmul operands to `compute_dtype`. Done once, outside the hot path."""
    w1, b1 = params["w1"], params["b1"]
    w2, b2 = params["w2"], params["b2"]
    wa, ba = params["wa"], params["ba"]
    wv, bv = params["wv"], params["bv"]

    state_size, fc1 = w1.shape
    fc2, action_size = wa.shape

    fc1_p = _round_up(fc1, lane)
    fc2_p = _round_up(fc2, lane)

    def pad2(a, rows, cols):
        return jnp.pad(a, ((0, rows - a.shape[0]), (0, cols - a.shape[1])))

    w1p = pad2(w1, state_size, fc1_p)
    b1p = pad2(b1, 1, fc1_p)
    w2p = pad2(w2, fc1_p, fc2_p)
    b2p = pad2(b2, 1, fc2_p)

    # Q = h2@Wa + ba (+ h2@Wv + bv)  ==  h2 @ (Wa + Wv·1ᵀ) + (ba + bv)
    if dueling_dqn:
        wh = wa + wv            # [fc2, A] + [fc2, 1] broadcast
        bh = ba + bv            # [1, A]  + [1, 1]
    else:
        wh = wa
        bh = ba
    # Head: pad only the K (fc2) dim; keep the narrow action_size output width.
    whp = pad2(wh, fc2_p, action_size)
    bhp = bh

    return dict(
        w1=w1p.astype(compute_dtype), b1=b1p.astype(jnp.float32),
        w2=w2p.astype(compute_dtype), b2=b2p.astype(jnp.float32),
        wh=whp.astype(compute_dtype), bh=bhp.astype(jnp.float32),
        state_size=state_size, action_size=action_size,
        compute_dtype=compute_dtype,
    )


# --------------------------------------------------------------------------- #
# Forward wrapper (keep the whole pad -> pallas_call -> slice under one jit)   #
# --------------------------------------------------------------------------- #
def qnetwork_forward(state, prepared, *, block_batch=4096):
    """state: [B, state_size] fp32.  Returns Q-values [B, action_size] fp32."""
    w1, b1 = prepared["w1"], prepared["b1"]
    w2, b2 = prepared["w2"], prepared["b2"]
    wh, bh = prepared["wh"], prepared["bh"]

    B, S = state.shape
    assert S == prepared["state_size"]
    A = prepared["action_size"]

    # Batch tiling: big tiles to amortize ~0.35 us/step grid overhead; for batches
    # larger than one tile, keep >= 4 grid steps so the "parallel" axis shards the
    # work across both v7x TensorCores (no-op on single-TC v5e/v6e).
    B8 = _round_up(B, 8)
    if B8 <= block_batch:
        TM = B8
    else:
        num_steps = max(4, pl.cdiv(B8, block_batch))
        TM = _round_up(pl.cdiv(B8, num_steps), 8)
    B_pad = _round_up(B8, TM)

    x = state
    if B_pad != B:
        x = jnp.pad(x, ((0, B_pad - B), (0, 0)))

    grid = (B_pad // TM,)

    def resident(arr):
        # Constant block index across the grid -> fetched once, VMEM-resident.
        return pl.BlockSpec(arr.shape, lambda i: (0, 0))

    out = pl.pallas_call(
        _qnetwork_kernel,
        out_shape=jax.ShapeDtypeStruct((B_pad, A), jnp.float32),
        grid=grid,
        in_specs=[
            pl.BlockSpec((TM, S), lambda i: (i, 0)),      # activations: tiled on batch
            resident(w1), resident(b1),
            resident(w2), resident(b2),
            resident(wh), resident(bh),
        ],
        # Narrow output block: last dim == full array dim (action_size), so this is
        # legal below 128 lanes; ~32x less HBM writeback than a 128-lane-padded slab.
        out_specs=pl.BlockSpec((TM, A), lambda i: (i, 0)),
        compiler_params=pltpu.CompilerParams(
            dimension_semantics=("parallel",),  # shard batch across TCs (v7x megacore)
            vmem_limit_bytes=32 * 1024 * 1024,  # plenty of headroom on all generations
        ),
    )(x, w1, b1, w2, b2, wh, bh)

    # Padded rows carry relu(bias)-derived garbage -> always slice back to [:B].
    return out[:B, :A]


# --------------------------------------------------------------------------- #
# Param init (mimics nn.Linear default U(-1/sqrt(fan_in), 1/sqrt(fan_in)))     #
# --------------------------------------------------------------------------- #
def init_qnetwork_params(key, state_size, action_size, fc1_units=128, fc2_units=64):
    def linear(k, fan_in, fan_out):
        kw, kb = jax.random.split(k)
        bound = 1.0 / jnp.sqrt(jnp.float32(fan_in))
        w = jax.random.uniform(kw, (fan_in, fan_out), jnp.float32, -bound, bound)
        b = jax.random.uniform(kb, (1, fan_out), jnp.float32, -bound, bound)
        return w, b

    k1, k2, k3, k4 = jax.random.split(key, 4)
    w1, b1 = linear(k1, state_size, fc1_units)
    w2, b2 = linear(k2, fc1_units, fc2_units)
    wa, ba = linear(k3, fc2_units, action_size)
    wv, bv = linear(k4, fc2_units, 1)
    return dict(w1=w1, b1=b1, w2=w2, b2=b2, wa=wa, ba=ba, wv=wv, bv=bv)


def _reference_forward(state, p, dueling_dqn):
    """Pure-JAX reference, written 1:1 against the PyTorch module."""
    h1 = jax.nn.relu(state @ p["w1"] + p["b1"])
    h2 = jax.nn.relu(h1 @ p["w2"] + p["b2"])
    adv = h2 @ p["wa"] + p["ba"]
    if dueling_dqn:
        val = h2 @ p["wv"] + p["bv"]
        return adv + val
    return adv


if __name__ == "__main__":
    key = jax.random.PRNGKey(0)
    k_params, k_state, k_big = jax.random.split(key, 3)

    batch = 2
    state_size = 8
    action_size = 4

    params = init_qnetwork_params(k_params, state_size, action_size)
    state = jax.random.normal(k_state, (batch, state_size), jnp.float32)

    # --- exact fp32 compute path: tight check vs the PyTorch-equivalent reference ---
    for dueling in (False, True):
        prepared = prepare_qnetwork_params(params, dueling_dqn=dueling,
                                           compute_dtype=jnp.float32)
        fwd = jax.jit(functools.partial(qnetwork_forward, prepared=prepared))
        out = jax.block_until_ready(fwd(state))
        ref = _reference_forward(state, params, dueling)
        assert out.shape == (batch, action_size)
        err = jnp.max(jnp.abs(out - ref))
        assert jnp.allclose(out, ref, atol=1e-4, rtol=1e-4), \
            f"fp32 mismatch (dueling={dueling}): max abs err {err}"

    # --- bf16 MXU fast path + multi-step grid (B=100, small block_batch -> 4 tiles) ---
    big_B = 100
    big_state = jax.random.normal(k_big, (big_B, state_size), jnp.float32)
    prepared_bf16 = prepare_qnetwork_params(params, dueling_dqn=True,
                                            compute_dtype=jnp.bfloat16)
    fwd_big = jax.jit(functools.partial(qnetwork_forward, prepared=prepared_bf16,
                                        block_batch=32))
    out_b = jax.block_until_ready(fwd_big(big_state))
    ref_b = _reference_forward(big_state, params, True)
    assert out_b.shape == (big_B, action_size)
    err_b = jnp.max(jnp.abs(out_b - ref_b))
    assert jnp.allclose(out_b, ref_b, atol=5e-2, rtol=5e-2), \
        f"bf16 mismatch: max abs err {err_b}"

    print("KERNEL_OK")
</pallas_src>

<mosaic_0001>
module attributes {stable_mosaic.version = 11 : i64} {
  func.func @_qnetwork_kernel(%arg0: i32, %arg1: memref<8x8xf32, #tpu.memory_space<vmem>>, %arg2: memref<8x128xf32, #tpu.memory_space<vmem>>, %arg3: memref<1x128xf32, #tpu.memory_space<vmem>>, %arg4: memref<128x128xf32, #tpu.memory_space<vmem>>, %arg5: memref<1x128xf32, #tpu.memory_space<vmem>>, %arg6: memref<128x4xf32, #tpu.memory_space<vmem>>, %arg7: memref<1x4xf32, #tpu.memory_space<vmem>>, %arg8: memref<8x4xf32, #tpu.memory_space<vmem>>) attributes {dimension_semantics = [#tpu.dimension_semantics<parallel>], iteration_bounds = array<i64: 1>, scalar_prefetch = 0 : i64, scratch_operands = 0 : i64, tpu.core_type = #tpu.core_type<tc>, window_params = [{transform_indices = @transform_0, window_bounds = array<i64: 8, 8>}, {pipeline_mode = #tpu.pipeline_mode<synchronous>, transform_indices = @transform_1, window_bounds = array<i64: 8, 128>}, {pipeline_mode = #tpu.pipeline_mode<synchronous>, transform_indices = @transform_2, window_bounds = array<i64: 1, 128>}, {pipeline_mode = #tpu.pipeline_mode<synchronous>, transform_indices = @transform_3, window_bounds = array<i64: 128, 128>}, {pipeline_mode = #tpu.pipeline_mode<synchronous>, transform_indices = @transform_4, window_bounds = array<i64: 1, 128>}, {pipeline_mode = #tpu.pipeline_mode<synchronous>, transform_indices = @transform_5, window_bounds = array<i64: 128, 4>}, {pipeline_mode = #tpu.pipeline_mode<synchronous>, transform_indices = @transform_6, window_bounds = array<i64: 1, 4>}, {transform_indices = @transform_7, window_bounds = array<i64: 8, 4>}]} {
    %c0 = arith.constant 0 : index
    %c0_0 = arith.constant 0 : index
    %0 = vector.load %arg1[%c0, %c0_0] : memref<8x8xf32, #tpu.memory_space<vmem>>, vector<8x8xf32>
    %c0_1 = arith.constant 0 : index
    %c0_2 = arith.constant 0 : index
    %1 = vector.load %arg2[%c0_1, %c0_2] : memref<8x128xf32, #tpu.memory_space<vmem>>, vector<8x128xf32>
    %cst = arith.constant dense<0.000000e+00> : vector<8x128xf32>
    %2 = tpu.matmul %0, %1, %cst {dimension_numbers = #tpu.dot_dimension_numbers<[1], [0], [0], [1], [0, 0, 1, 1], [], []>} : vector<8x8xf32>, vector<8x128xf32>, vector<8x128xf32> -> vector<8x128xf32>
    %c0_3 = arith.constant 0 : index
    %c0_4 = arith.constant 0 : index
    %3 = vector.load %arg3[%c0_3, %c0_4] : memref<1x128xf32, #tpu.memory_space<vmem>>, vector<1x128xf32>
    %4 = vector.broadcast %3 : vector<1x128xf32> to vector<8x128xf32>
    %5 = arith.addf %2, %4 : vector<8x128xf32>
    %cst_5 = arith.constant 0.000000e+00 : f32
    %6 = vector.broadcast %cst_5 : f32 to vector<8x128xf32>
    %7 = arith.maximumf %5, %6 : vector<8x128xf32>
    %c0_6 = arith.constant 0 : index
    %c0_7 = arith.constant 0 : index
    %8 = vector.load %arg4[%c0_6, %c0_7] : memref<128x128xf32, #tpu.memory_space<vmem>>, vector<128x128xf32>
    %cst_8 = arith.constant dense<0.000000e+00> : vector<8x128xf32>
    %9 = tpu.matmul %7, %8, %cst_8 {dimension_numbers = #tpu.dot_dimension_numbers<[1], [0], [0], [1], [0, 0, 1, 1], [], []>} : vector<8x128xf32>, vector<128x128xf32>, vector<8x128xf32> -> vector<8x128xf32>
    %c0_9 = arith.constant 0 : index
    %c0_10 = arith.constant 0 : index
    %10 = vector.load %arg5[%c0_9, %c0_10] : memref<1x128xf32, #tpu.memory_space<vmem>>, vector<1x128xf32>
    %11 = vector.broadcast %10 : vector<1x128xf32> to vector<8x128xf32>
    %12 = arith.addf %9, %11 : vector<8x128xf32>
    %cst_11 = arith.constant 0.000000e+00 : f32
    %13 = vector.broadcast %cst_11 : f32 to vector<8x128xf32>
    %14 = arith.maximumf %12, %13 : vector<8x128xf32>
    %c0_12 = arith.constant 0 : index
    %c0_13 = arith.constant 0 : index
    %15 = vector.load %arg6[%c0_12, %c0_13] : memref<128x4xf32, #tpu.memory_space<vmem>>, vector<128x4xf32>
    %cst_14 = arith.constant dense<0.000000e+00> : vector<8x4xf32>
    %16 = tpu.matmul %14, %15, %cst_14 {dimension_numbers = #tpu.dot_dimension_numbers<[1], [0], [0], [1], [0, 0, 1, 1], [], []>} : vector<8x128xf32>, vector<128x4xf32>, vector<8x4xf32> -> vector<8x4xf32>
    %c0_15 = arith.constant 0 : index
    %c0_16 = arith.constant 0 : index
    %17 = vector.load %arg7[%c0_15, %c0_16] : memref<1x4xf32, #tpu.memory_space<vmem>>, vector<1x4xf32>
    %18 = vector.broadcast %17 : vector<1x4xf32> to vector<8x4xf32>
    %19 = arith.addf %16, %18 : vector<8x4xf32>
    %c0_17 = arith.constant 0 : index
    %c0_18 = arith.constant 0 : index
    %20 = vector.load %arg8[%c0_17, %c0_18] : memref<8x4xf32, #tpu.memory_space<vmem>>, vector<8x4xf32>
    tpu.vector_store %arg8[%c0_17, %c0_18], %19 {strides = array<i32>} : memref<8x4xf32, #tpu.memory_space<vmem>>, vector<8x4xf32>,
    return
  }
  func.func @transform_0(%arg0: i32) -> (i32, i32) {
    %c0_i32 = arith.constant 0 : i32
    %c0_i32_0 = arith.constant 0 : i32
    return %arg0, %c0_i32 : i32, i32
  }
  func.func @transform_1(%arg0: i32) -> (i32, i32) {
    %c0_i32 = arith.constant 0 : i32
    %c0_i32_0 = arith.constant 0 : i32
    %c0_i32_1 = arith.constant 0 : i32
    return %c0_i32, %c0_i32_0 : i32, i32
  }
  func.func @transform_2(%arg0: i32) -> (i32, i32) {
    %c0_i32 = arith.constant 0 : i32
    %c0_i32_0 = arith.constant 0 : i32
    %c0_i32_1 = arith.constant 0 : i32
    return %c0_i32, %c0_i32_0 : i32, i32
  }
  func.func @transform_3(%arg0: i32) -> (i32, i32) {
    %c0_i32 = arith.constant 0 : i32
    %c0_i32_0 = arith.constant 0 : i32
    %c0_i32_1 = arith.constant 0 : i32
    return %c0_i32, %c0_i32_0 : i32, i32
  }
  func.func @transform_4(%arg0: i32) -> (i32, i32) {
    %c0_i32 = arith.constant 0 : i32
    %c0_i32_0 = arith.constant 0 : i32
    %c0_i32_1 = arith.constant 0 : i32
    return %c0_i32, %c0_i32_0 : i32, i32
  }
  func.func @transform_5(%arg0: i32) -> (i32, i32) {
    %c0_i32 = arith.constant 0 : i32
    %c0_i32_0 = arith.constant 0 : i32
    %c0_i32_1 = arith.constant 0 : i32
    return %c0_i32, %c0_i32_0 : i32, i32
  }
  func.func @transform_6(%arg0: i32) -> (i32, i32) {
    %c0_i32 = arith.constant 0 : i32
    %c0_i32_0 = arith.constant 0 : i32
    %c0_i32_1 = arith.constant 0 : i32
    return %c0_i32, %c0_i32_0 : i32, i32
  }
  func.func @transform_7(%arg0: i32) -> (i32, i32) {
    %c0_i32 = arith.constant 0 : i32
    %c0_i32_0 = arith.constant 0 : i32
    return %arg0, %c0_i32 : i32, i32
  }
}

</mosaic_0001>

<bundles_post_ra>
// kernel: qnetwork_forward.1
= control target key start
LH: loop header
LB: loop body
LE: loop exit
PB: predicated region body
PF: predicated region fallthrough
CT: control target
= control target key end

     0   :  { %12 = vsyncpa [#allocation3], 0  ;;  %s306_s0 = inlined_call_operand.vmem [shape: f32[8,8], index: 0, kind: input, shape index: {}]   ;;  %s307_s1 = inlined_call_operand.vmem [shape: f32[8,128], index: 1, kind: input, shape index: {}]   ;;  %s308_s2 = inlined_call_operand.vmem [shape: f32[1,128], index: 2, kind: input, shape index: {}]   ;;  %s309_s3 = inlined_call_operand.hbm [shape: f32[128,128], index: 3, kind: input, shape index: {}]   ;;  %s310_s4 = inlined_call_operand.vmem [shape: f32[1,128], index: 4, kind: input, shape index: {}]   ;;  %s311_s5 = inlined_call_operand.hbm [shape: f32[128,4], index: 5, kind: input, shape index: {}]   ;;  %s312_s6 = inlined_call_operand.vmem [shape: f32[1,4], index: 6, kind: input, shape index: {}]   ;;  %s313_s7 = inlined_call_operand.vmem [shape: f32[8,4], index: 7, kind: output, shape index: {}]  }
   0x1   :  { %s24_s26 = sshll.u32 %s309_s3, 4  ;;  %s25_s26 = int_to_ptr.hbm [resolvable:$true] %s24_s26 }
   0x2   :  { %13 = vsyncpa [#allocation5], 0  ;;  %s238_s27 = smov [#allocation2]   ;;  %s39_s8 = sshll.u32 %s311_s5, 4  ;;  %s40_s8 = int_to_ptr.hbm [resolvable:$true] %s39_s8 }
   0x3   :  { %s26_s28 = sshll.u32 %s238_s27, 4  ;;  %s239_s9 = smov 128   ;;  %s27_s28 = int_to_ptr.vmem [resolvable:$true] %s26_s28 }
   0x4   :  { %s240_s10 = smov 8   ;;  %s241_s11 = smov [#allocation4]  }
   0x5   :  { %32 = dma.hbm_to_vmem [thread:$0]  %s25_s26, 2048, %s27_s28, [#allocation3], %s239_s9, %s239_s9, %s240_s10  }
   0x6   :  { %s41_s12 = sshll.u32 %s241_s11, 4  ;;  %s42_s12 = int_to_ptr.vmem [resolvable:$true] %s41_s12 }
   0x7   :  { %47 = dma.hbm_to_vmem [thread:$0]  %s40_s8, 2048, %s42_s12, [#allocation5], %s239_s9, %s239_s9, %s240_s10  }
   0x8   :  { %234 = dma.done.wait [#allocation3], 2048  }
   0x9   :  { %235 = vsyncadd [#allocation3], 4294965248 }
   0xa   :  { %236 = dma.done.wait [#allocation5], 2048  }
   0xb   :  { %237 = vsyncadd [#allocation5], 4294965248  ;;  %vm64_vm0 = vcmask 64512   ;;  %v59_v0 = vld [vmem:[%s307_s1] sm:$0xff]  ;;  %v104_v2 = vld [vmem:[#allocation2 + $0x78] sm:$0xff]  ;;  %vm170_vm1 = vcmask 31744  }
   0xc   :  { %v58_v1 = vld [vmem:[%s306_s0] sm:$0xff]  ;;  %83 = vmatpush.msra.mxu0 %v59_v0  ;;  %109 = vmatpush.msra.mxu1 %v104_v2  ;;  %v103_v3 = vld [vmem:[#allocation2 + $0x70] sm:$0xff]  ;;  %v102_v4 = vld [vmem:[#allocation2 + $0x68] sm:$0xff] }
   0xd   :  { %178 = vmatmul.msk.f32.vlgmr.msra.gmra.mxu0 %vm64_vm0, %v58_v1  ;;  %v101_v5 = vld [vmem:[#allocation2 + $0x60] sm:$0xff]  ;;  %v100_v6 = vld [vmem:[#allocation2 + $0x58] sm:$0xff]  ;;  %v99_v7 = vld [vmem:[#allocation2 + $0x50] sm:$0xff] }
   0xe   :  { %110 = vmatpush.msra.mxu1 %v103_v3  ;;  %v98_v8 = vld [vmem:[#allocation2 + $0x48] sm:$0xff]  ;;  %v97_v9 = vld [vmem:[#allocation2 + $0x40] sm:$0xff]  ;;  %v96_v10 = vld [vmem:[#allocation2 + $0x38] sm:$0xff] }
   0xf   :  { %v95_v11 = vld [vmem:[#allocation2 + $0x30] sm:$0xff]  ;;  %v94_v12 = vld [vmem:[#allocation2 + $0x28] sm:$0xff]  ;;  %v93_v13 = vld [vmem:[#allocation2 + $0x20] sm:$0xff] }
  0x10   :  { %111 = vmatpush.msra.mxu1 %v102_v4  ;;  %v92_v14 = vld [vmem:[#allocation2 + $0x18] sm:$0xff]  ;;  %v91_v15 = vld [vmem:[#allocation2 + $0x10] sm:$0xff]  ;;  %v90_v16 = vld [vmem:[#allocation2 + $0x8] sm:$0xff] }
  0x11   :  { %v89_v17 = vld [vmem:[#allocation2] sm:$0xff]  ;;  %v145_v18 = vld [vmem:[#allocation4 + $0x78] sm:$0xff]  ;;  %v144_v19 = vld [vmem:[#allocation4 + $0x70] sm:$0xff] }
  0x12   :  { %112 = vmatpush.msra.mxu1 %v101_v5  ;;  %150 = vmatpush.msra.mxu2 %v145_v18  ;;  %v143_v20 = vld [vmem:[#allocation4 + $0x68] sm:$0xff]  ;;  %v142_v21 = vld [vmem:[#allocation4 + $0x60] sm:$0xff]  ;;  %v141_v22 = vld [vmem:[#allocation4 + $0x58] sm:$0xff] }
  0x13   :  { %v140_v23 = vld [vmem:[#allocation4 + $0x50] sm:$0xff]  ;;  %v139_v24 = vld [vmem:[#allocation4 + $0x48] sm:$0xff]  ;;  %v138_v25 = vld [vmem:[#allocation4 + $0x40] sm:$0xff] }
  0x14   :  { %113 = vmatpush.msra.mxu1 %v100_v6  ;;  %151 = vmatpush.msra.mxu2 %v144_v19  ;;  %v137_v26 = vld [vmem:[#allocation4 + $0x38] sm:$0xff]  ;;  %v136_v27 = vld [vmem:[#allocation4 + $0x30] sm:$0xff]  ;;  %v135_v28 = vld [vmem:[#allocation4 + $0x28] sm:$0xff] }
  0x15   :  { %v134_v29 = vld [vmem:[#allocation4 + $0x20] sm:$0xff]  ;;  %v133_v30 = vld [vmem:[#allocation4 + $0x18] sm:$0xff]  ;;  %v132_v35 = vld [vmem:[#allocation4 + $0x10] sm:$0xff] }
  0x16   :  { %114 = vmatpush.msra.mxu1 %v99_v7  ;;  %152 = vmatpush.msra.mxu2 %v143_v20  ;;  %v183_v31 = vld [vmem:[%s308_s2] ss:$0 sm:$0xff]  ;;  %v131_v36 = vld [vmem:[#allocation4 + $0x8] sm:$0xff] }
  0x17   :  { %v130_v37 = vld [vmem:[#allocation4] sm:$0xff] }
  0x18   :  { %115 = vmatpush.msra.mxu1 %v98_v8  ;;  %153 = vmatpush.msra.mxu2 %v142_v21  ;;  %v184_v38 = vld [vmem:[%s310_s4] ss:$0 sm:$0xff] }
  0x19   :  { %v185_v42 = vld [vmem:[%s312_s6] ss:$0 sm:$0xff] }
  0x1a   :  { %116 = vmatpush.msra.mxu1 %v97_v9  ;;  %154 = vmatpush.msra.mxu2 %v141_v22 }
  0x1c   :  { %117 = vmatpush.msra.mxu1 %v96_v10  ;;  %155 = vmatpush.msra.mxu2 %v140_v23 }
  0x1e   :  { %118 = vmatpush.msra.mxu1 %v95_v11  ;;  %156 = vmatpush.msra.mxu2 %v139_v24 }
  0x20   :  { %119 = vmatpush.msra.mxu1 %v94_v12  ;;  %157 = vmatpush.msra.mxu2 %v138_v25 }
  0x22   :  { %120 = vmatpush.msra.mxu1 %v93_v13  ;;  %158 = vmatpush.msra.mxu2 %v137_v26 }
  0x24   :  { %121 = vmatpush.msra.mxu1 %v92_v14  ;;  %159 = vmatpush.msra.mxu2 %v136_v27 }
  0x26   :  { %122 = vmatpush.msra.mxu1 %v91_v15  ;;  %160 = vmatpush.msra.mxu2 %v135_v28 }
  0x28   :  { %123 = vmatpush.msra.mxu1 %v90_v16  ;;  %161 = vmatpush.msra.mxu2 %v134_v29 }
  0x2a   :  { %124 = vmatpush.msra.mxu1 %v89_v17  ;;  %162 = vmatpush.msra.mxu2 %v133_v30 }
  0x2c   :  { %163 = vmatpush.msra.mxu2 %v132_v35 }
  0x2e   :  { %164 = vmatpush.msra.mxu2 %v131_v36 }
  0x30   :  { %165 = vmatpush.msra.mxu2 %v130_v37 }
  0x8a   :  { %v85_v32 = vpop.f32.mrf.mxu0 }
  0x8b   :  { %v86_v33 = vadd.f32 %v183_v31, %v85_v32 }
  0x8d   :  { %v88_v34 = vmax.f32 %v86_v33, 0.0 }
  0x8f   :  { %125 = vmatmul.f32.vlgmr.msra.gmra.mxu1 %v88_v34 }
 0x10c   :  { %v126_v39 = vpop.f32.mrf.mxu1 }
 0x10d   :  { %v127_v40 = vadd.f32 %v184_v38, %v126_v39 }
 0x10f   :  { %v129_v41 = vmax.f32 %v127_v40, 0.0 }
 0x111   :  { %166 = vmatmul.f32.vlgmr.msra.gmra.mxu2 %v129_v41 }
 0x194   :  { %v167_v43 = vpop.f32.mrf.mxu2 }
 0x195   :  { %v168_v44 = vadd.f32 %v185_v42, %v167_v43 }
 0x197   :  { %171 = vst.msk [vmem:[%s313_s7] sm:$0xff] %vm170_vm1, %v168_v44 }
 0x198   :  { %176 = vsyncpa [#allocation3], 1 }
 0x199   :  { %177 = vsyncpa [#allocation5], 1 }

</bundles_post_ra>
